<compile_context>
chip_gen: v6e
topology: v6e:2x2x1
jax: 0.10.0
libtpu: 0.0.40
codegen_flags: <defaults>
</compile_context>

<pallas_src>
import jax
import jax.numpy as jnp
from jax.experimental import pallas as pl
from jax.experimental.pallas import tpu as pltpu


def base_attention_kernel(x_ref, y_ref, w_ref, b_ref,
                          xatt_ref, yatt_ref, attn_ref):
    # x_ref: (Bt, Lx, D), y_ref: (Bt, Ly, D), w_ref: (D, D) == W^T, b_ref: (1, D)
    bt, lx, d = x_ref.shape
    ly = y_ref.shape[1]

    x = x_ref[...]                    # (Bt, Lx, D)
    y = y_ref[...]                    # (Bt, Ly, D)
    w = w_ref[...]                    # (D, D)
    b = b_ref[...]                    # (1, D)

    # ---- Linear fused across the whole batch tile: (Bt*Lx, D) @ (D, D) ----
    x2 = x.reshape(bt * lx, d)
    _x2 = jnp.dot(x2, w, preferred_element_type=jnp.float32) + b
    _x = _x2.reshape(bt, lx, d)       # (Bt, Lx, D)

    # ---- attention = bmm(_x, y^T) as a contraction (no transpose materialized)
    attn = jnp.einsum('bld,bmd->blm', _x, y,
                      preferred_element_type=jnp.float32)        # (Bt, Lx, Ly)
    # attn^T via a second MXU contraction (MXU has slack; keeps the XLU free).
    attn_t = jnp.einsum('bmd,bld->bml', y, _x,
                        preferred_element_type=jnp.float32)      # (Bt, Ly, Lx)

    # ---- x_attention = softmax(attn, dim=2) @ y ----
    m_r = jnp.max(attn, axis=-1, keepdims=True)
    e_r = jnp.exp(attn - m_r)
    p_r = e_r / jnp.sum(e_r, axis=-1, keepdims=True)             # exact divide
    x_att = jnp.einsum('blm,bmd->bld', p_r, y,
                       preferred_element_type=jnp.float32)       # (Bt, Lx, D)

    # ---- y_attention = softmax(attn, dim=1)^T @ x ----
    # softmax over dim=1 of attn, transposed == row softmax of attn^T.
    m_c = jnp.max(attn_t, axis=-1, keepdims=True)
    e_c = jnp.exp(attn_t - m_c)
    p_ct = e_c / jnp.sum(e_c, axis=-1, keepdims=True)            # exact divide
    y_att = jnp.einsum('bml,bld->bmd', p_ct, x,
                       preferred_element_type=jnp.float32)       # (Bt, Ly, D)

    xatt_ref[...] = x_att.astype(xatt_ref.dtype)
    yatt_ref[...] = y_att.astype(yatt_ref.dtype)
    attn_ref[...] = attn.astype(attn_ref.dtype)


def base_attention(x, y, weight, bias, *, b_tile=None):
    """x: (B, Lx, D), y: (B, Ly, D), weight: (D, D) torch Linear layout (out, in),
    bias: (D,). Returns (x_attention, y_attention, attention)."""
    B, Lx, D = x.shape
    _, Ly, _ = y.shape
    if b_tile is None:
        # Largest batch tile <= 8 that divides B (whole batch for small B).
        b_tile = next(t for t in range(min(B, 8), 0, -1) if B % t == 0)
    assert B % b_tile == 0

    w_t = weight.T                    # kernel computes x @ W^T
    b2 = bias.reshape(1, D)

    out_shapes = (
        jax.ShapeDtypeStruct((B, Lx, D), jnp.float32),
        jax.ShapeDtypeStruct((B, Ly, D), jnp.float32),
        jax.ShapeDtypeStruct((B, Lx, Ly), jnp.float32),
    )

    grid_spec = pltpu.PrefetchScalarGridSpec(
        num_scalar_prefetch=0,
        grid=(B // b_tile,),
        in_specs=[
            pl.BlockSpec((b_tile, Lx, D), lambda i: (i, 0, 0)),
            pl.BlockSpec((b_tile, Ly, D), lambda i: (i, 0, 0)),
            pl.BlockSpec((D, D), lambda i: (0, 0)),   # weight: resident
            pl.BlockSpec((1, D), lambda i: (0, 0)),   # bias:   resident
        ],
        out_specs=[
            pl.BlockSpec((b_tile, Lx, D), lambda i: (i, 0, 0)),
            pl.BlockSpec((b_tile, Ly, D), lambda i: (i, 0, 0)),
            pl.BlockSpec((b_tile, Lx, Ly), lambda i: (i, 0, 0)),
        ],
    )

    flops = 2 * B * (Lx * D * D + 4 * Lx * Ly * D)
    transcendentals = 2 * B * Lx * Ly
    bytes_accessed = 4 * (2 * B * Lx * D + 2 * B * Ly * D
                          + D * D + D + B * Lx * Ly)

    return pl.pallas_call(
        base_attention_kernel,
        out_shape=out_shapes,
        grid_spec=grid_spec,
        compiler_params=pltpu.CompilerParams(
            dimension_semantics=("parallel",)),
        cost_estimate=pl.CostEstimate(
            flops=flops,
            transcendentals=transcendentals,
            bytes_accessed=bytes_accessed),
    )(x, y, w_t, b2)


def base_attention_ref(x, y, weight, bias):
    _x = jnp.einsum("bld,ed->ble", x, weight) + bias
    attn = jnp.einsum("bld,bmd->blm", _x, y)
    x_att = jnp.einsum("blm,bmd->bld", jax.nn.softmax(attn, axis=2), y)
    y_att = jnp.einsum("blm,bld->bmd", jax.nn.softmax(attn, axis=1), x)
    return x_att, y_att, attn


if __name__ == "__main__":
    key = jax.random.PRNGKey(0)
    B, Lx, Ly, D = 2, 8, 8, 32        # D = args.max_option_length
    kx, ky, kw, kb = jax.random.split(key, 4)

    x = jax.random.normal(kx, (B, Lx, D), dtype=jnp.float32)
    y = jax.random.normal(ky, (B, Ly, D), dtype=jnp.float32)
    bound = 1.0 / (D ** 0.5)          # torch Linear default init range
    weight = jax.random.uniform(kw, (D, D), jnp.float32, -bound, bound)
    bias = jax.random.uniform(kb, (D,), jnp.float32, -bound, bound)

    x_att, y_att, attn = jax.block_until_ready(
        base_attention(x, y, weight, bias))

    x_att_r, y_att_r, attn_r = base_attention_ref(x, y, weight, bias)
    assert x_att.shape == x_att_r.shape
    assert y_att.shape == y_att_r.shape
    assert attn.shape == attn_r.shape
    assert jnp.allclose(attn, attn_r, atol=1e-4, rtol=1e-4)
    assert jnp.allclose(x_att, x_att_r, atol=1e-3, rtol=1e-3)
    assert jnp.allclose(y_att, y_att_r, atol=1e-3, rtol=1e-3)

    print("KERNEL_OK")
</pallas_src>

<mosaic_0001>
module attributes {stable_mosaic.version = 11 : i64} {
  func.func @base_attention_kernel(%arg0: i32, %arg1: memref<2x8x32xf32, #tpu.memory_space<vmem>>, %arg2: memref<2x8x32xf32, #tpu.memory_space<vmem>>, %arg3: memref<32x32xf32, #tpu.memory_space<vmem>>, %arg4: memref<1x32xf32, #tpu.memory_space<vmem>>, %arg5: memref<2x8x32xf32, #tpu.memory_space<vmem>>, %arg6: memref<2x8x32xf32, #tpu.memory_space<vmem>>, %arg7: memref<2x8x8xf32, #tpu.memory_space<vmem>>) attributes {dimension_semantics = [#tpu.dimension_semantics<parallel>], iteration_bounds = array<i64: 1>, scalar_prefetch = 0 : i64, scratch_operands = 0 : i64, tpu.core_type = #tpu.core_type<tc>, window_params = [{transform_indices = @transform_0, window_bounds = array<i64: 2, 8, 32>}, {transform_indices = @transform_1, window_bounds = array<i64: 2, 8, 32>}, {pipeline_mode = #tpu.pipeline_mode<synchronous>, transform_indices = @transform_2, window_bounds = array<i64: 32, 32>}, {pipeline_mode = #tpu.pipeline_mode<synchronous>, transform_indices = @transform_3, window_bounds = array<i64: 1, 32>}, {transform_indices = @transform_4, window_bounds = array<i64: 2, 8, 32>}, {transform_indices = @transform_5, window_bounds = array<i64: 2, 8, 32>}, {transform_indices = @transform_6, window_bounds = array<i64: 2, 8, 8>}]} {
    %c0 = arith.constant 0 : index
    %c0_0 = arith.constant 0 : index
    %c0_1 = arith.constant 0 : index
    %0 = vector.load %arg1[%c0, %c0_0, %c0_1] : memref<2x8x32xf32, #tpu.memory_space<vmem>>, vector<2x8x32xf32>
    %c0_2 = arith.constant 0 : index
    %c0_3 = arith.constant 0 : index
    %c0_4 = arith.constant 0 : index
    %1 = vector.load %arg2[%c0_2, %c0_3, %c0_4] : memref<2x8x32xf32, #tpu.memory_space<vmem>>, vector<2x8x32xf32>
    %c0_5 = arith.constant 0 : index
    %c0_6 = arith.constant 0 : index
    %2 = vector.load %arg3[%c0_5, %c0_6] : memref<32x32xf32, #tpu.memory_space<vmem>>, vector<32x32xf32>
    %c0_7 = arith.constant 0 : index
    %c0_8 = arith.constant 0 : index
    %3 = vector.load %arg4[%c0_7, %c0_8] : memref<1x32xf32, #tpu.memory_space<vmem>>, vector<1x32xf32>
    %4 = vector.shape_cast %0 : vector<2x8x32xf32> to vector<16x32xf32>
    %cst = arith.constant dense<0.000000e+00> : vector<16x32xf32>
    %5 = tpu.matmul %4, %2, %cst {dimension_numbers = #tpu.dot_dimension_numbers<[1], [0], [0], [1], [0, 0, 1, 1], [], []>} : vector<16x32xf32>, vector<32x32xf32>, vector<16x32xf32> -> vector<16x32xf32>
    %6 = vector.broadcast %3 : vector<1x32xf32> to vector<16x32xf32>
    %7 = arith.addf %5, %6 : vector<16x32xf32>
    %8 = vector.shape_cast %7 : vector<16x32xf32> to vector<2x8x32xf32>
    "tpu.trace_start"() <{level = 10 : i32, message = "bld,bmd->blm"}> : () -> ()
    %cst_9 = arith.constant dense<0.000000e+00> : vector<2x8x8xf32>
    %9 = tpu.matmul %8, %1, %cst_9 {dimension_numbers = #tpu.dot_dimension_numbers<[2], [2], [1], [1], [0, 0, 0, 1, 1, 1], [0], [0]>} : vector<2x8x32xf32>, vector<2x8x32xf32>, vector<2x8x8xf32> -> vector<2x8x8xf32>
    "tpu.trace_stop"() : () -> ()
    "tpu.trace_start"() <{level = 10 : i32, message = "bmd,bld->bml"}> : () -> ()
    %cst_10 = arith.constant dense<0.000000e+00> : vector<2x8x8xf32>
    %10 = tpu.matmul %1, %8, %cst_10 {dimension_numbers = #tpu.dot_dimension_numbers<[2], [2], [1], [1], [0, 0, 0, 1, 1, 1], [0], [0]>} : vector<2x8x32xf32>, vector<2x8x32xf32>, vector<2x8x8xf32> -> vector<2x8x8xf32>
    "tpu.trace_stop"() : () -> ()
    %cst_11 = arith.constant dense<0xFF800000> : vector<2x8xf32>
    %11 = vector.multi_reduction <maximumf>, %9, %cst_11 [2] : vector<2x8x8xf32> to vector<2x8xf32>
    %12 = vector.shape_cast %11 : vector<2x8xf32> to vector<2x8x1xf32>
    %13 = vector.broadcast %12 : vector<2x8x1xf32> to vector<2x8x8xf32>
    %14 = arith.subf %9, %13 : vector<2x8x8xf32>
    %15 = math.exp %14 : vector<2x8x8xf32>
    %cst_12 = arith.constant dense<0.000000e+00> : vector<2x8xf32>
    %16 = vector.multi_reduction <add>, %15, %cst_12 [2] : vector<2x8x8xf32> to vector<2x8xf32>
    %17 = vector.shape_cast %16 : vector<2x8xf32> to vector<2x8x1xf32>
    %18 = vector.broadcast %17 : vector<2x8x1xf32> to vector<2x8x8xf32>
    %19 = arith.divf %15, %18 : vector<2x8x8xf32>
    "tpu.trace_start"() <{level = 10 : i32, message = "blm,bmd->bld"}> : () -> ()
    %cst_13 = arith.constant dense<0.000000e+00> : vector<2x8x32xf32>
    %20 = tpu.matmul %19, %1, %cst_13 {dimension_numbers = #tpu.dot_dimension_numbers<[2], [1], [1], [2], [0, 0, 0, 1, 1, 2], [0], [0]>} : vector<2x8x8xf32>, vector<2x8x32xf32>, vector<2x8x32xf32> -> vector<2x8x32xf32>
    "tpu.trace_stop"() : () -> ()
    %cst_14 = arith.constant dense<0xFF800000> : vector<2x8xf32>
    %21 = vector.multi_reduction <maximumf>, %10, %cst_14 [2] : vector<2x8x8xf32> to vector<2x8xf32>
    %22 = vector.shape_cast %21 : vector<2x8xf32> to vector<2x8x1xf32>
    %23 = vector.broadcast %22 : vector<2x8x1xf32> to vector<2x8x8xf32>
    %24 = arith.subf %10, %23 : vector<2x8x8xf32>
    %25 = math.exp %24 : vector<2x8x8xf32>
    %cst_15 = arith.constant dense<0.000000e+00> : vector<2x8xf32>
    %26 = vector.multi_reduction <add>, %25, %cst_15 [2] : vector<2x8x8xf32> to vector<2x8xf32>
    %27 = vector.shape_cast %26 : vector<2x8xf32> to vector<2x8x1xf32>
    %28 = vector.broadcast %27 : vector<2x8x1xf32> to vector<2x8x8xf32>
    %29 = arith.divf %25, %28 : vector<2x8x8xf32>
    "tpu.trace_start"() <{level = 10 : i32, message = "bml,bld->bmd"}> : () -> ()
    %cst_16 = arith.constant dense<0.000000e+00> : vector<2x8x32xf32>
    %30 = tpu.matmul %29, %0, %cst_16 {dimension_numbers = #tpu.dot_dimension_numbers<[2], [1], [1], [2], [0, 0, 0, 1, 1, 2], [0], [0]>} : vector<2x8x8xf32>, vector<2x8x32xf32>, vector<2x8x32xf32> -> vector<2x8x32xf32>
    "tpu.trace_stop"() : () -> ()
    %c0_17 = arith.constant 0 : index
    %c0_18 = arith.constant 0 : index
    %c0_19 = arith.constant 0 : index
    %31 = vector.load %arg5[%c0_17, %c0_18, %c0_19] : memref<2x8x32xf32, #tpu.memory_space<vmem>>, vector<2x8x32xf32>
    tpu.vector_store %arg5[%c0_17, %c0_18, %c0_19], %20 {strides = array<i32>} : memref<2x8x32xf32, #tpu.memory_space<vmem>>, vector<2x8x32xf32>,
    %c0_20 = arith.constant 0 : index
    %c0_21 = arith.constant 0 : index
    %c0_22 = arith.constant 0 : index
    %32 = vector.load %arg6[%c0_20, %c0_21, %c0_22] : memref<2x8x32xf32, #tpu.memory_space<vmem>>, vector<2x8x32xf32>
    tpu.vector_store %arg6[%c0_20, %c0_21, %c0_22], %30 {strides = array<i32>} : memref<2x8x32xf32, #tpu.memory_space<vmem>>, vector<2x8x32xf32>,
    %c0_23 = arith.constant 0 : index
    %c0_24 = arith.constant 0 : index
    %c0_25 = arith.constant 0 : index
    %33 = vector.load %arg7[%c0_23, %c0_24, %c0_25] : memref<2x8x8xf32, #tpu.memory_space<vmem>>, vector<2x8x8xf32>
    tpu.vector_store %arg7[%c0_23, %c0_24, %c0_25], %9 {strides = array<i32>} : memref<2x8x8xf32, #tpu.memory_space<vmem>>, vector<2x8x8xf32>,
    return
  }
  func.func @transform_0(%arg0: i32) -> (i32, i32, i32) {
    %c0_i32 = arith.constant 0 : i32
    %c0_i32_0 = arith.constant 0 : i32
    %c0_i32_1 = arith.constant 0 : i32
    return %arg0, %c0_i32, %c0_i32_0 : i32, i32, i32
  }
  func.func @transform_1(%arg0: i32) -> (i32, i32, i32) {
    %c0_i32 = arith.constant 0 : i32
    %c0_i32_0 = arith.constant 0 : i32
    %c0_i32_1 = arith.constant 0 : i32
    return %arg0, %c0_i32, %c0_i32_0 : i32, i32, i32
  }
  func.func @transform_2(%arg0: i32) -> (i32, i32) {
    %c0_i32 = arith.constant 0 : i32
    %c0_i32_0 = arith.constant 0 : i32
    %c0_i32_1 = arith.constant 0 : i32
    return %c0_i32, %c0_i32_0 : i32, i32
  }
  func.func @transform_3(%arg0: i32) -> (i32, i32) {
    %c0_i32 = arith.constant 0 : i32
    %c0_i32_0 = arith.constant 0 : i32
    %c0_i32_1 = arith.constant 0 : i32
    return %c0_i32, %c0_i32_0 : i32, i32
  }
  func.func @transform_4(%arg0: i32) -> (i32, i32, i32) {
    %c0_i32 = arith.constant 0 : i32
    %c0_i32_0 = arith.constant 0 : i32
    %c0_i32_1 = arith.constant 0 : i32
    return %arg0, %c0_i32, %c0_i32_0 : i32, i32, i32
  }
  func.func @transform_5(%arg0: i32) -> (i32, i32, i32) {
    %c0_i32 = arith.constant 0 : i32
    %c0_i32_0 = arith.constant 0 : i32
    %c0_i32_1 = arith.constant 0 : i32
    return %arg0, %c0_i32, %c0_i32_0 : i32, i32, i32
  }
  func.func @transform_6(%arg0: i32) -> (i32, i32, i32) {
    %c0_i32 = arith.constant 0 : i32
    %c0_i32_0 = arith.constant 0 : i32
    %c0_i32_1 = arith.constant 0 : i32
    return %arg0, %c0_i32, %c0_i32_0 : i32, i32, i32
  }
}

</mosaic_0001>

<bundles_post_ra>
// kernel: tpu_custom_call.1
= control target key start
LH: loop header
LB: loop body
LE: loop exit
PB: predicated region body
PF: predicated region fallthrough
CT: control target
= control target key end

     0   :  { %12 = vsyncpa [#allocation3], 0  ;;  %s1230_s0 = inlined_call_operand.hbm [shape: f32[2,8,32], index: 0, kind: input, shape index: {}]   ;;  %s1231_s1 = inlined_call_operand.hbm [shape: f32[2,8,32], index: 1, kind: input, shape index: {}]   ;;  %s1232_s2 = inlined_call_operand.hbm [shape: f32[32,32], index: 2, kind: input, shape index: {}]   ;;  %s1233_s3 = inlined_call_operand.vmem [shape: f32[1,32], index: 3, kind: input, shape index: {}]   ;;  %s1234_s4 = inlined_call_operand.hbm [shape: f32[2,8,32], index: 4, kind: output, shape index: {0}]   ;;  %s1235_s5 = inlined_call_operand.hbm [shape: f32[2,8,32], index: 5, kind: output, shape index: {1}]   ;;  %s1236_s6 = inlined_call_operand.hbm [shape: f32[2,8,8], index: 6, kind: output, shape index: {2}]  }
   0x1   :  { %13 = vsyncpa [#allocation6], 0 }
   0x2   :  { %14 = vsyncpa [#allocation4], 0 }
   0x3   :  { %15 = vsyncpa [#allocation10], 0  ;;  %s1086_s21 = smov [#allocation5]   ;;  %s1087_s23 = smov [#allocation2]  }
   0x4   :  { %s33_s22 = sshll.u32 %s1086_s21, 4  ;;  %s21_s24 = sshll.u32 %s1087_s23, 4  ;;  %s34_s22 = int_to_ptr.vmem [resolvable:$true] %s33_s22  ;;  %s22_s24 = int_to_ptr.vmem [resolvable:$true] %s21_s24 }
   0x5   :  { %s966_s25 = scalar_lea.vmem %s34_s22, 256  ;;  %p971_p1 = scmp.lt.s32.totalorder %s34_s22, %s34_s22 }
   0x6   :  { %p967_p0 = scmp.ne.s32.totalorder %s34_s22, %s966_s25  ;;  %p972_p2 = scmp.lt.s32.totalorder %s966_s25, %s966_s25 }
   0x8   :  { %p973_p3 = por %p972_p2, %p971_p1 }
   0xa   :  { %p974_p4 = pnand %p973_p3, %p967_p0 }
   0xc   :  { %977 = shalt.err (!%p974_p4)
}
   0xd   :  { %s1088_s26 = smov 128   ;;  %s1089_s27 = smov 8  }
   0xe   :  { %39 = dma.hbm_to_vmem [thread:$0]  %s1231_s1, 256, %s34_s22, [#allocation6], %s1088_s26, %s1088_s26, %s1089_s27  }
   0xf   :  { %s986_s30 = scalar_lea.vmem %s22_s24, 256  ;;  %p991_p6 = scmp.lt.s32.totalorder %s22_s24, %s22_s24 }
  0x10   :  { %p987_p5 = scmp.ne.s32.totalorder %s22_s24, %s986_s30  ;;  %p992_p7 = scmp.lt.s32.totalorder %s986_s30, %s986_s30 }
  0x12   :  { %p993_p8 = por %p992_p7, %p991_p6 }
  0x14   :  { %p994_p9 = pnand %p993_p8, %p987_p5 }
  0x16   :  { %997 = shalt.err (!%p994_p9)
}
  0x17   :  { %27 = dma.hbm_to_vmem [thread:$0]  %s1230_s0, 256, %s22_s24, [#allocation3], %s1088_s26, %s1088_s26, %s1089_s27  }
  0x18   :  { %s1090_s9 = smov [#allocation7]  }
  0x19   :  { %s45_s10 = sshll.u32 %s1090_s9, 4  ;;  %s46_s10 = int_to_ptr.vmem [resolvable:$true] %s45_s10 }
  0x1a   :  { %s1006_s11 = scalar_lea.vmem %s46_s10, 512  ;;  %p1011_p11 = scmp.lt.s32.totalorder %s46_s10, %s46_s10 }
  0x1b   :  { %p1007_p10 = scmp.ne.s32.totalorder %s46_s10, %s1006_s11  ;;  %p1012_p12 = scmp.lt.s32.totalorder %s1006_s11, %s1006_s11 }
  0x1d   :  { %p1013_p13 = por %p1012_p12, %p1011_p11 }
  0x1f   :  { %p1014_p0 = pnand %p1013_p13, %p1007_p10 }
  0x21   :  { %1017 = shalt.err (!%p1014_p0)
}
  0x22   :  { %51 = dma.hbm_to_vmem [thread:$0]  %s1232_s2, 512, %s46_s10, [#allocation6], %s1088_s26, %s1088_s26, %s1089_s27  }
  0x23   :  { %1078 = dma.done.wait [#allocation3], 256  }
  0x24   :  { %1079 = vsyncadd [#allocation3], 4294967040 }
  0x25   :  { %1080 = dma.done.wait [#allocation6], 768  }
  0x26   :  { %1081 = vsyncadd [#allocation6], 4294966528  ;;  %vm78_vm0 = vcmask 261120   ;;  %v70_v0 = vld [vmem:[#allocation7 + $0x18] sm:$0xff]  ;;  %v69_v1 = vld [vmem:[#allocation7 + $0x10] sm:$0xff]  ;;  %v1091_v6 = vmov 0.0  }
  0x27   :  { %881 = vmatprep.subr.mxu0 %v70_v0  ;;  %v1149_v2 = vld [vmem:[#allocation2] sm:$0xff]  ;;  %v68_v3 = vld [vmem:[#allocation7 + $0x8] sm:$0xff]  ;;  %892 = vmatprep.subr.mxu1 %v1091_v6  ;;  %v65_v7 = vld [vmem:[#allocation5] sm:$0xff]  ;;  %vm1092_vm1 = vmmov 0   ;;  %vm452_vm2 = vcmask 64512   ;;  %s1094_s14 = smov [#allocation9]  }
  0x28   :  { %882 = vmatpush3.msra.mxu0 %v70_v0  ;;  %889 = vmatprep.mubr.msk.f32.mxu0 %vm78_vm0, %v1149_v2  ;;  %v67_v4 = vld [vmem:[#allocation7] sm:$0xff]  ;;  %v1153_v5 = vld [vmem:[#allocation2 + $0x8] sm:$0xff]  ;;  %v66_v12 = vld [vmem:[#allocation5 + $0x8] sm:$0xff]  ;;  %s812_s15 = sshll.u32 %s1094_s14, 4  ;;  %s1095_s16 = smov [#allocation11]   ;;  %s813_s15 = int_to_ptr.vmem [resolvable:$true] %s812_s15 }
  0x29   :  { %883 = vmatprep.subr.mxu0 %v69_v1  ;;  %893 = vmatpush3.xpose.msk.msra.mxu1 %vm78_vm0, %v65_v7  ;;  %v844_v9 = vld [vmem:[%s1233_s3] ss:$0 sm:$0xff]  ;;  %s1093_s3 = smov [#allocation8]   ;;  %s824_s17 = sshll.u32 %s1095_s16, 4  ;;  %s825_s17 = int_to_ptr.vmem [resolvable:$true] %s824_s17 }
  0x2a   :  { %884 = vmatpush3.msra.mxu0 %v69_v1  ;;  %897 = vmatprep.subr.mxu1 %v1091_v6  ;;  %s800_s13 = sshll.u32 %s1093_s3, 4  ;;  %s801_s13 = int_to_ptr.vmem [resolvable:$true] %s800_s13 }
  0x2b   :  { %885 = vmatprep.subr.mxu0 %v68_v3  ;;  %894 = vmatprep.mubr.msk.f32.mxu1 %vm1092_vm1, %v1091_v6  ;;  %s1018_s18 = scalar_lea.vmem %s801_s13, 256  ;;  %p1023_p2 = scmp.lt.s32.totalorder %s801_s13, %s801_s13 }
  0x2c   :  { %886 = vmatpush3.msra.mxu0 %v68_v3  ;;  %p1019_p1 = scmp.ne.s32.totalorder %s801_s13, %s1018_s18  ;;  %p1024_p3 = scmp.lt.s32.totalorder %s1018_s18, %s1018_s18 }
  0x2d   :  { %887 = vmatprep.subr.mxu0 %v67_v4 }
  0x2e   :  { %888 = vmatpush3.msra.mxu0 %v67_v4  ;;  %p1025_p4 = por %p1024_p3, %p1023_p2 }
  0x2f   :  { %890 = vmatmul.mubr.msk.f32.vlgmr.msra.gmra.mxu0 %vm78_vm0, %v1153_v5  ;;  %902 = vmatprep.subr.mxu0 %v1091_v6 }
  0x30   :  { %904 = vmatprep.mubr.msk.f32.mxu0 %vm1092_vm1, %v1091_v6  ;;  %p1026_p5 = pnand %p1025_p4, %p1019_p1 }
  0xef   :  { %v891_v8 = vpop.f32.mrf.mxu0 }
  0xf0   :  { %v157_v13 = vadd.f32 %v891_v8, %v844_v9 }
  0xf1   :  { %v151_v10 = vpop.f32.mrf.mxu0 }
  0xf2   :  { %v152_v11 = vadd.f32 %v844_v9, %v151_v10 }
  0xf4   :  { %895 = vmatmul.mubr.msk.f32.vlgmr.msra.gmra.mxu1 %vm78_vm0, %v152_v11  ;;  %903 = vmatpush3.xpose.msk.msra.mxu0 %vm78_vm0, %v152_v11 }
  0xf5   :  { %898 = vmatpush3.xpose.msk.msra.mxu1 %vm78_vm0, %v66_v12  ;;  %899 = vmatprep.mubr.msk.f32.mxu1 %vm1092_vm1, %v1091_v6 }
  0xf6   :  { %907 = vmatprep.subr.mxu1 %v1091_v6  ;;  %912 = vmatprep.subr.mxu0 %v1091_v6 }
  0xf7   :  { %905 = vmatmul.mubr.msk.f32.vlgmr.msra.gmra.mxu0 %vm78_vm0, %v65_v7 }
  0xf8   :  { %900 = vmatmul.mubr.msk.f32.vlgmr.msra.gmra.mxu1 %vm78_vm0, %v157_v13  ;;  %913 = vmatpush3.msra.mxu0 %v65_v7 }
  0xf9   :  { %908 = vmatpush3.xpose.msk.msra.mxu1 %vm78_vm0, %v157_v13  ;;  %909 = vmatprep.mubr.msk.f32.mxu1 %vm1092_vm1, %v1091_v6 }
  0xfa   :  { %914 = vmatprep.mubr.msk.f32.mxu0 %vm1092_vm1, %v1091_v6  ;;  %917 = vmatprep.subr.mxu1 %v1091_v6 }
  0xfb   :  { %922 = vmatprep.subr.mxu0 %v1091_v6 }
  0xfc   :  { %910 = vmatmul.mubr.msk.f32.vlgmr.msra.gmra.mxu1 %vm78_vm0, %v66_v12 }
  0xfd   :  { %918 = vmatpush3.msra.mxu1 %v66_v12  ;;  %919 = vmatprep.mubr.msk.f32.mxu1 %vm1092_vm1, %v1091_v6 }
  0xfe   :  { %927 = vmatprep.subr.mxu1 %v1091_v6 }
 0x1b4   :  { %v232_v14 = vpop.f32.mrf.mxu1 }
 0x1b5   :  { %793 = vst.msk [vmem:[#allocation11] sm:$0xff] %vm452_vm2, %v232_v14  ;;  %v453_v15 = vsel %vm452_vm2, %v232_v14, -inf }
 0x1b6   :  { %454 = vmax.xlane.f32.xlu0 %v453_v15  ;;  %v896_v16 = vpop.f32.mrf.mxu1 }
 0x1b7   :  { %v378_v17 = vpop.f32.mrf.mxu0 }
 0x1b8   :  { %v308_v18 = vpop.f32.mrf.mxu1  ;;  %v621_v19 = vsel %vm452_vm2, %v378_v17, -inf }
 0x1b9   :  { %794 = vst.msk [vmem:[#allocation11 + $0x8] sm:$0xff] %vm452_vm2, %v308_v18  ;;  %622 = vmax.xlane.f32.xlu1 %v621_v19  ;;  %v906_v20 = vpop.f32.mrf.mxu0  ;;  %v456_v21 = vsel %vm452_vm2, %v308_v18, -inf }
 0x1ba   :  { %457 = vmax.xlane.f32.xlu0 %v456_v21  ;;  %v901_v22 = vpop.f32.mrf.mxu1 }
 0x1bc   :  { %v448_v23 = vpop.f32.mrf.mxu1 }
 0x1bd   :  { %v624_v24 = vsel %vm452_vm2, %v448_v23, -inf }
 0x1be   :  { %625 = vmax.xlane.f32.xlu1 %v624_v24  ;;  %v911_v25 = vpop.f32.mrf.mxu1 }
 0x23f   :  { %v455_v26 = vpop.xlane.xlu0 %454 }
 0x240   :  { %v459_v27 = vsub.f32 %v232_v14, %v455_v26 }
 0x242   :  { %v461_v28 = vmul.f32 1.442695, %v459_v27  ;;  %v623_v29 = vpop.xlane.xlu1 %622 }
 0x243   :  { %v627_v30 = vsub.f32 %v378_v17, %v623_v29  ;;  %v458_v31 = vpop.xlane.xlu0 %457 }
 0x244   :  { %942 = vpow2.f32 %v461_v28  ;;  %v460_v32 = vsub.f32 %v308_v18, %v458_v31 }
 0x245   :  { %v629_v33 = vmul.f32 1.442695, %v627_v30 }
 0x246   :  { %v463_v34 = vmul.f32 1.442695, %v460_v32 }
 0x247   :  { %944 = vpow2.f32 %v629_v33  ;;  %v626_v35 = vpop.xlane.xlu1 %625 }
 0x248   :  { %946 = vpow2.f32 %v463_v34  ;;  %v628_v36 = vsub.f32 %v448_v23, %v626_v35 }
 0x24a   :  { %v631_v37 = vmul.f32 1.442695, %v628_v36 }
 0x24c   :  { %948 = vpow2.f32 %v631_v37 }
 0x251   :  { %v943_v38 = vpop.eup %942 }
 0x252   :  { %v465_v39 = vsel %vm452_vm2, %v943_v38, 0.0 }
 0x253   :  { %466 = vadd.xlane.f32.xlu0 %v465_v39 }
 0x254   :  { %v945_v40 = vpop.eup %944 }
 0x255   :  { %v947_v41 = vpop.eup %946  ;;  %v633_v42 = vsel %vm452_vm2, %v945_v40, 0.0 }
 0x256   :  { %v468_v43 = vsel %vm452_vm2, %v947_v41, 0.0 }
 0x257   :  { %634 = vadd.xlane.f32.xlu0 %v633_v42  ;;  %469 = vadd.xlane.f32.xlu1 %v468_v43 }
 0x259   :  { %v949_v44 = vpop.eup %948 }
 0x25a   :  { %v636_v45 = vsel %vm452_vm2, %v949_v44, 0.0 }
 0x25b   :  { %637 = vadd.xlane.f32.xlu1 %v636_v45 }
 0x2dc   :  { %v467_v46 = vpop.xlane.xlu0 %466 }
 0x2dd   :  { %950 = vrcp.f32 %v467_v46 }
 0x2e0   :  { %v635_v47 = vpop.xlane.xlu0 %634  ;;  %v470_v48 = vpop.xlane.xlu1 %469 }
 0x2e1   :  { %952 = vrcp.f32 %v635_v47 }
 0x2e2   :  { %954 = vrcp.f32 %v470_v48 }
 0x2e4   :  { %v638_v49 = vpop.xlane.xlu1 %637 }
 0x2e5   :  { %956 = vrcp.f32 %v638_v49 }
 0x2ea   :  { %v951_v50 = vpop.eup %950 }
 0x2eb   :  { %v472_v51 = vmul.f32 %v951_v50, %v943_v38 }
 0x2ed   :  { %915 = vmatmul.mubr.msk.f32.vlgmr.msra.gmra.mxu0 %vm452_vm2, %v472_v51 }
 0x2ee   :  { %v953_v52 = vpop.eup %952  ;;  %923 = vmatpush3.msra.mxu0 %v1149_v2  ;;  %924 = vmatprep.mubr.msk.f32.mxu0 %vm1092_vm1, %v1091_v6 }
 0x2ef   :  { %v955_v53 = vpop.eup %954  ;;  %v640_v54 = vmul.f32 %v953_v52, %v945_v40 }
 0x2f0   :  { %v474_v55 = vmul.f32 %v955_v53, %v947_v41 }
 0x2f1   :  { %925 = vmatmul.mubr.msk.f32.vlgmr.msra.gmra.mxu0 %vm452_vm2, %v640_v54 }
 0x2f2   :  { %v957_v56 = vpop.eup %956  ;;  %920 = vmatmul.mubr.msk.f32.vlgmr.msra.gmra.mxu1 %vm452_vm2, %v474_v55 }
 0x2f3   :  { %928 = vmatpush3.msra.mxu1 %v1153_v5  ;;  %929 = vmatprep.mubr.msk.f32.mxu1 %vm1092_vm1, %v1091_v6  ;;  %v642_v57 = vmul.f32 %v957_v56, %v949_v44 }
 0x2f6   :  { %930 = vmatmul.mubr.msk.f32.vlgmr.msra.gmra.mxu1 %vm452_vm2, %v642_v57 }
 0x3ad   :  { %v544_v58 = vpop.f32.mrf.mxu0 }
 0x3ae   :  { %789 = vst.msk [vmem:[#allocation8] sm:$0xff] %vm78_vm0, %v544_v58 }
 0x3af   :  { %v916_v59 = vpop.f32.mrf.mxu0 }
 0x3b1   :  { %v712_v60 = vpop.f32.mrf.mxu0 }
 0x3b2   :  { %v617_v61 = vpop.f32.mrf.mxu1  ;;  %791 = vst.msk [vmem:[#allocation9] sm:$0xff] %vm78_vm0, %v712_v60 }
 0x3b3   :  { %790 = vst.msk [vmem:[#allocation8 + $0x8] sm:$0xff] %vm78_vm0, %v617_v61  ;;  %v926_v62 = vpop.f32.mrf.mxu0 }
 0x3b4   :  { %v921_v63 = vpop.f32.mrf.mxu1 }
 0x3b5   :  { %1029 = shalt.err (!%p1026_p5)
}
 0x3b6   :  { %806 = dma.vmem_to_hbm [thread:$0]  %s801_s13, 256, %s1234_s4, [#allocation4], %s1088_s26, %s1088_s26, %s1089_s27   ;;  %v785_v0 = vpop.f32.mrf.mxu1 }
 0x3b7   :  { %792 = vst.msk [vmem:[#allocation9 + $0x8] sm:$0xff] %vm78_vm0, %v785_v0  ;;  %s1038_s21 = scalar_lea.vmem %s813_s15, 256  ;;  %p1043_p7 = scmp.lt.s32.totalorder %s813_s15, %s813_s15 }
 0x3b8   :  { %v931_v1 = vpop.f32.mrf.mxu1  ;;  %p1039_p6 = scmp.ne.s32.totalorder %s813_s15, %s1038_s21  ;;  %p1044_p8 = scmp.lt.s32.totalorder %s1038_s21, %s1038_s21 }
 0x3ba   :  { %p1045_p9 = por %p1044_p8, %p1043_p7 }
 0x3bc   :  { %p1046_p10 = pnand %p1045_p9, %p1039_p6 }
 0x3be   :  { %1049 = shalt.err (!%p1046_p10)
}
 0x3bf   :  { %818 = dma.vmem_to_hbm [thread:$0]  %s813_s15, 256, %s1235_s5, [#allocation10], %s1088_s26, %s1088_s26, %s1089_s27  }
 0x3c0   :  { %s1058_s4 = scalar_lea.vmem %s825_s17, 256  ;;  %p1063_p12 = scmp.lt.s32.totalorder %s825_s17, %s825_s17 }
 0x3c1   :  { %p1059_p11 = scmp.ne.s32.totalorder %s825_s17, %s1058_s4  ;;  %p1064_p13 = scmp.lt.s32.totalorder %s1058_s4, %s1058_s4 }
 0x3c3   :  { %p1065_p0 = por %p1064_p13, %p1063_p12 }
 0x3c5   :  { %p1066_p1 = pnand %p1065_p0, %p1059_p11 }
 0x3c7   :  { %1069 = shalt.err (!%p1066_p1)
}
 0x3c8   :  { %830 = dma.vmem_to_hbm [thread:$0]  %s825_s17, 256, %s1236_s6, [#allocation10], %s1088_s26, %s1088_s26, %s1089_s27  }
 0x3c9   :  { %1082 = dma.done.wait [#allocation4], 256  }
 0x3ca   :  { %1083 = vsyncadd [#allocation4], 4294967040 }
 0x3cb   :  { %1084 = dma.done.wait [#allocation10], 512  }
 0x3cc   :  { %1085 = vsyncadd [#allocation10], 4294966784 }
 0x3cd   :  { %840 = vsyncpa [#allocation3], 1 }
 0x3ce   :  { %841 = vsyncpa [#allocation6], 1 }
 0x3cf   :  { %842 = vsyncpa [#allocation4], 1 }
 0x3d0   :  { %843 = vsyncpa [#allocation10], 1 }

</bundles_post_ra>
